<compile_context>
chip_gen: v5e
topology: v5e:2x2
jax: 0.10.0
libtpu: 0.0.40
codegen_flags: <defaults>
</compile_context>

<pallas_src>
import functools

import jax
import jax.numpy as jnp
from jax import lax
from jax.experimental import pallas as pl
from jax.experimental.pallas import tpu as pltpu


_LANES = 128
_SUBLANES = 8
_REDUCE_TILE_ROWS = 8192          # 4 MiB f32 tiles (input-only stream)
_APPLY_TILE_ROWS = 4096           # 2 MiB f32 tiles (in+out stream + tanh/round temps)
_FUSE_MAX_ELEMS = 1 << 20         # <= 4 MiB f32 -> single fused kernel
_VMEM_LIMIT = 32 * 1024 * 1024    # scoped VMEM budget, safe on v5e / v6e / v7x
_NCORES = 2                       # phase-0 split for v7x megacore


def _round_up(a: int, b: int) -> int:
    return ((a + b - 1) // b) * b


# ------------------------- fused single-pass kernel --------------------------

def _fused_kernel(x_ref, o_ref, *, w_bit, inv_n):
    x = x_ref[...].astype(jnp.float32)
    if w_bit == 1:
        # E = mean|x| over the TRUE element count (zero padding contributes 0).
        E = jnp.sum(jnp.abs(x), keepdims=True) * inv_n            # (1, 1)
        o_ref[...] = (jnp.sign(x) * E).astype(o_ref.dtype)
    else:
        n_levels = float(2 ** w_bit - 1)
        # max|tanh x| == tanh(max|x|): one tanh on a (1,1), not N transcendentals.
        max_w = jnp.tanh(jnp.max(jnp.abs(x), keepdims=True))       # (1, 1)
        w = jnp.tanh(x)
        wn = w * (0.5 / max_w) + 0.5
        q = jnp.round(wn * n_levels) * (1.0 / n_levels)
        o_ref[...] = (max_w * (2.0 * q - 1.0)).astype(o_ref.dtype)


# ------------------------- phase 0: streaming reduce --------------------------

def _reduce_kernel(x_ref, out_ref, acc_ref, *, tile_rows, tiles_per_core,
                   valid_rows, is_sum, needs_mask):
    i = pl.program_id(1)

    @pl.when(i == 0)
    def _init():
        acc_ref[...] = jnp.zeros_like(acc_ref)

    x = jnp.abs(x_ref[...].astype(jnp.float32))
    if needs_mask:
        # Logical (un-clamped) tile index decides which rows are real data; rows
        # past `valid_rows` (ragged last tile / clamped duplicate tiles on the
        # second core) contribute the identity 0 to both sum and max.
        c = pl.program_id(0)
        row0 = (c * tiles_per_core + i) * tile_rows
        row_ids = row0 + lax.broadcasted_iota(jnp.int32, (tile_rows, 1), 0)
        x = jnp.where(row_ids < valid_rows, x, 0.0)

    # Elementwise (VPU-only) accumulation into an (8,128) partial; no per-tile
    # cross-lane reduce and no serialized (1,1) read-modify-write.
    xr = x.reshape(tile_rows // _SUBLANES, _SUBLANES, _LANES)
    if is_sum:
        acc_ref[...] += jnp.sum(xr, axis=0)
    else:
        acc_ref[...] = jnp.maximum(acc_ref[...], jnp.max(xr, axis=0))

    @pl.when(i == pl.num_programs(1) - 1)
    def _finalize():
        if is_sum:
            out_ref[0] = jnp.sum(acc_ref[...], keepdims=True)
        else:
            out_ref[0] = jnp.max(acc_ref[...], keepdims=True)


# ---------------------------- phase 1: apply ----------------------------------

def _sign_apply_kernel(p_ref, x_ref, o_ref):
    # p_ref (SMEM): [E] with E = mean|x|.  sign(x / E) * E == sign(x) * E for E > 0.
    x = x_ref[...].astype(jnp.float32)
    o_ref[...] = (jnp.sign(x) * p_ref[0]).astype(o_ref.dtype)


def _dorefa_apply_kernel(p_ref, x_ref, o_ref, *, n_levels):
    # p_ref (SMEM): [max_w, 0.5 / max_w] with max_w = tanh(max|x|) == max|tanh x|.
    max_w = p_ref[0]
    half_inv_max = p_ref[1]
    w = jnp.tanh(x_ref[...].astype(jnp.float32))
    wn = w * half_inv_max + 0.5
    q = jnp.round(wn * n_levels) * (1.0 / n_levels)
    o_ref[...] = (max_w * (2.0 * q - 1.0)).astype(o_ref.dtype)


# -------------------------------- wrapper --------------------------------------

def weight_quantize(x: jax.Array, w_bit: int, *,
                    fuse_threshold_elems: int = _FUSE_MAX_ELEMS) -> jax.Array:
    """Pallas implementation of weight_quantize_fn.forward (w_bit static)."""
    assert w_bit <= 8 or w_bit == 32
    if w_bit == 32:
        return x                                   # identity: no kernel, no copies

    orig_shape = x.shape
    orig_dtype = x.dtype
    n = int(x.size)

    flat = x.reshape(-1)
    padded_n = _round_up(n, _SUBLANES * _LANES)    # rows become a multiple of 8
    needs_pad = padded_n != n
    if needs_pad:
        # Zero padding contributes the identity to sum|x| and max|x|; the 1-bit mean
        # divides by the true count n, so no in-kernel validity mask is needed here.
        flat = jnp.pad(flat, (0, padded_n - n))
    rows = padded_n // _LANES
    x2 = flat.reshape(rows, _LANES)                # lane-dense slab

    if padded_n <= fuse_threshold_elems:
        # ---- fused single pass: read + write only ----
        out2 = pl.pallas_call(
            functools.partial(_fused_kernel, w_bit=w_bit, inv_n=1.0 / float(n)),
            out_shape=jax.ShapeDtypeStruct((rows, _LANES), orig_dtype),
            compiler_params=pltpu.CompilerParams(vmem_limit_bytes=_VMEM_LIMIT),
        )(x2)
    else:
        # ---- phase 0: streaming reduction, split across 2 TCs on v7x ----
        reduce_rows = min(_REDUCE_TILE_ROWS, rows)
        tiles_total = pl.cdiv(rows, reduce_rows)
        tiles_per_core = pl.cdiv(tiles_total, _NCORES)
        needs_mask = (_NCORES * tiles_per_core * reduce_rows) != rows

        def x_index_map(c, i):
            t = c * tiles_per_core + i
            # Clamp duplicate/overhanging tiles; their rows are masked out in-kernel.
            return (jnp.minimum(t, tiles_total - 1), 0)

        partials = pl.pallas_call(
            functools.partial(_reduce_kernel, tile_rows=reduce_rows,
                              tiles_per_core=tiles_per_core, valid_rows=rows,
                              is_sum=(w_bit == 1), needs_mask=needs_mask),
            out_shape=jax.ShapeDtypeStruct((_NCORES, 1, 1), jnp.float32),
            grid=(_NCORES, tiles_per_core),
            in_specs=[pl.BlockSpec((reduce_rows, _LANES), x_index_map)],
            out_specs=pl.BlockSpec((1, 1, 1), lambda c, i: (c, 0, 0)),
            scratch_shapes=[pltpu.VMEM((_SUBLANES, _LANES), jnp.float32)],
            compiler_params=pltpu.CompilerParams(
                dimension_semantics=("parallel", "arbitrary"),
                vmem_limit_bytes=_VMEM_LIMIT),
        )(x2)

        # Tiny scalar prep: combine per-core partials; tanh applied ONCE to the
        # scalar (max|tanh x| == tanh(max|x|)); reciprocal precomputed once.
        if w_bit == 1:
            params = (jnp.sum(partials) * (1.0 / float(n))).reshape(1).astype(jnp.float32)
            apply_kernel = _sign_apply_kernel
        else:
            max_w = jnp.tanh(jnp.max(partials))
            params = jnp.stack([max_w, 0.5 / max_w]).astype(jnp.float32)
            apply_kernel = functools.partial(_dorefa_apply_kernel,
                                             n_levels=float(2 ** w_bit - 1))

        # ---- phase 1: elementwise apply, "parallel" tiles (2 TCs on v7x) ----
        apply_rows = min(_APPLY_TILE_ROWS, rows)
        out2 = pl.pallas_call(
            apply_kernel,
            out_shape=jax.ShapeDtypeStruct((rows, _LANES), orig_dtype),
            grid=(pl.cdiv(rows, apply_rows),),
            in_specs=[pl.BlockSpec(memory_space=pltpu.MemorySpace.SMEM),
                      pl.BlockSpec((apply_rows, _LANES), lambda i: (i, 0))],
            out_specs=pl.BlockSpec((apply_rows, _LANES), lambda i: (i, 0)),
            compiler_params=pltpu.CompilerParams(
                dimension_semantics=("parallel",),
                vmem_limit_bytes=_VMEM_LIMIT),
        )(params, x2)

    if needs_pad:
        return out2.reshape(-1)[:n].reshape(orig_shape)
    return out2.reshape(orig_shape)


# ------------------------------ reference & test -------------------------------

def _reference(x: jax.Array, w_bit: int) -> jax.Array:
    """Pure-JAX reference mirroring the PyTorch forward exactly."""
    xf = x.astype(jnp.float32)
    if w_bit == 32:
        return x
    elif w_bit == 1:
        E = jnp.mean(jnp.abs(xf))
        return (jnp.sign(xf / E) * E).astype(x.dtype)
    else:
        n = float(2 ** w_bit - 1)
        w = jnp.tanh(xf)
        max_w = jnp.max(jnp.abs(w))
        wq = w / 2.0 / max_w + 0.5
        q = jnp.round(wq * n) / n
        return (max_w * (2.0 * q - 1.0)).astype(x.dtype)


def _check(out, ref, x, w_bit) -> bool:
    if out.shape != x.shape or out.dtype != x.dtype:
        return False
    if bool(jnp.allclose(out, ref, atol=1e-5, rtol=1e-5)):
        return True
    if w_bit in (1, 32):
        return False
    # k-bit only: a jnp.round tie sitting exactly on a half-integer boundary can
    # resolve differently between kernel and XLA reference (1-2 ulp of accumulated
    # fp difference); tolerate a vanishing fraction of one-quant-step differences.
    n_levels = float(2 ** w_bit - 1)
    max_w = jnp.max(jnp.abs(jnp.tanh(x.astype(jnp.float32))))
    step = 2.0 * max_w / n_levels
    diff = jnp.abs(out.astype(jnp.float32) - ref.astype(jnp.float32))
    mismatched = diff > (1e-5 + 1e-5 * jnp.abs(ref.astype(jnp.float32)))
    frac = float(jnp.mean(mismatched.astype(jnp.float32)))
    return bool(jnp.all(diff <= step * 1.01 + 1e-5)) and frac < 1e-3


if __name__ == "__main__":
    key = jax.random.PRNGKey(0)
    # Small conv-weight-like tensor (OIHW ordering, like a PyTorch Conv2d weight).
    x_small = jax.random.normal(key, (2, 4, 16, 16), dtype=jnp.float32) * 0.5

    ok = True
    for w_bit in (4, 1, 32):
        out = jax.block_until_ready(weight_quantize(x_small, w_bit))
        ref = jax.block_until_ready(_reference(x_small, w_bit))
        ok = ok and _check(out, ref, x_small, w_bit)

    # Also exercise the large-tensor two-phase streaming path (forced by disabling
    # the fused fast path) on a modest tensor, including ragged-tile masking.
    x_big = jax.random.normal(jax.random.PRNGKey(1), (8, 16, 32, 32),
                              dtype=jnp.float32) * 0.5
    for w_bit in (4, 1):
        out = jax.block_until_ready(
            weight_quantize(x_big, w_bit, fuse_threshold_elems=0))
        ref = jax.block_until_ready(_reference(x_big, w_bit))
        ok = ok and _check(out, ref, x_big, w_bit)

    print("KERNEL_OK" if ok else "KERNEL_MISMATCH")
</pallas_src>

<mosaic_0001>
module attributes {stable_mosaic.version = 11 : i64} {
  func.func @_fused_kernel(%arg0: memref<16x128xf32, #tpu.memory_space<vmem>>, %arg1: memref<16x128xf32, #tpu.memory_space<vmem>>) attributes {dimension_semantics = [], scalar_prefetch = 0 : i64, scratch_operands = 0 : i64, tpu.core_type = #tpu.core_type<tc>} {
    %c0 = arith.constant 0 : index
    %c0_0 = arith.constant 0 : index
    %0 = vector.load %arg0[%c0, %c0_0] : memref<16x128xf32, #tpu.memory_space<vmem>>, vector<16x128xf32>
    %1 = math.absf %0 : vector<16x128xf32>
    %2 = vector.shape_cast %1 : vector<16x128xf32> to vector<1x16x128xf32>
    %cst = arith.constant dense<0xFF800000> : vector<1xf32>
    %3 = vector.multi_reduction <maximumf>, %2, %cst [1, 2] : vector<1x16x128xf32> to vector<1xf32>
    %4 = vector.shape_cast %3 : vector<1xf32> to vector<1x1x1xf32>
    %5 = vector.extract %4[0, 0, 0] : f32 from vector<1x1x1xf32>
    %6 = vector.broadcast %5 : f32 to vector<1x1xf32>
    %7 = math.tanh %6 : vector<1x1xf32>
    %8 = math.tanh %0 : vector<16x128xf32>
    %cst_1 = arith.constant 5.000000e-01 : f32
    %9 = vector.broadcast %cst_1 : f32 to vector<1x1xf32>
    %10 = arith.divf %9, %7 : vector<1x1xf32>
    %11 = vector.broadcast %10 : vector<1x1xf32> to vector<16x128xf32>
    %12 = arith.mulf %8, %11 : vector<16x128xf32>
    %cst_2 = arith.constant 5.000000e-01 : f32
    %13 = vector.broadcast %cst_2 : f32 to vector<16x128xf32>
    %14 = arith.addf %12, %13 : vector<16x128xf32>
    %cst_3 = arith.constant 1.500000e+01 : f32
    %15 = vector.broadcast %cst_3 : f32 to vector<16x128xf32>
    %16 = arith.mulf %14, %15 : vector<16x128xf32>
    %17 = math.roundeven %16 : vector<16x128xf32>
    %cst_4 = arith.constant 0.0666666701 : f32
    %18 = vector.broadcast %cst_4 : f32 to vector<16x128xf32>
    %19 = arith.mulf %17, %18 : vector<16x128xf32>
    %cst_5 = arith.constant 2.000000e+00 : f32
    %20 = vector.broadcast %cst_5 : f32 to vector<16x128xf32>
    %21 = arith.mulf %20, %19 : vector<16x128xf32>
    %cst_6 = arith.constant 1.000000e+00 : f32
    %22 = vector.broadcast %cst_6 : f32 to vector<16x128xf32>
    %23 = arith.subf %21, %22 : vector<16x128xf32>
    %24 = vector.broadcast %7 : vector<1x1xf32> to vector<16x128xf32>
    %25 = arith.mulf %24, %23 : vector<16x128xf32>
    %c0_7 = arith.constant 0 : index
    %c0_8 = arith.constant 0 : index
    %26 = vector.load %arg1[%c0_7, %c0_8] : memref<16x128xf32, #tpu.memory_space<vmem>>, vector<16x128xf32>
    tpu.vector_store %arg1[%c0_7, %c0_8], %25 {strides = array<i32>} : memref<16x128xf32, #tpu.memory_space<vmem>>, vector<16x128xf32>,
    return
  }
}

</mosaic_0001>

<bundles_post_ra>
// kernel: tpu_custom_call.1
= control target key start
LH: loop header
LB: loop body
LE: loop exit
PB: predicated region body
PF: predicated region fallthrough
CT: control target
= control target key end

     0   :  { %6 = vsyncpa [#allocation3], 0  ;;  %s205_s0 = inlined_call_operand.hbm [shape: f32[16,128], index: 0, kind: input, shape index: {}]   ;;  %s206_s1 = inlined_call_operand.hbm [shape: f32[16,128], index: 1, kind: output, shape index: {}]  }
   0x1   :  { %7 = vsyncpa [#allocation4], 0  ;;  %s12_s8 = sshll.u32 %s205_s0, 4  ;;  %s179_s9 = smov [#allocation2]   ;;  %s13_s8 = int_to_ptr.hbm [resolvable:$true] %s12_s8 }
   0x2   :  { %s14_s10 = sshll.u32 %s179_s9, 4  ;;  %s180_s11 = smov 128   ;;  %s15_s10 = int_to_ptr.vmem [resolvable:$true] %s14_s10 }
   0x3   :  { %s181_s12 = smov 8  }
   0x4   :  { %20 = dma.hbm_to_vmem [thread:$0]  %s13_s8, 256, %s15_s10, [#allocation3], %s180_s11, %s180_s11, %s181_s12  }
   0x5   :  { %175 = dma.done.wait [#allocation3], 256  }
   0x6   :  { %176 = vsyncadd [#allocation3], 4294967040  ;;  %v25_v0 = vld [vmem:[#allocation2] sm:$0xff]  ;;  %v26_v1 = vld [vmem:[#allocation2 + $0x8] sm:$0xff]  ;;  %s182_s13 = smov [#allocation5]   ;;  %s82_s17 = sshll.u32 %s206_s1, 4  ;;  %s83_s17 = int_to_ptr.hbm [resolvable:$true] %s82_s17 }
   0x7   :  { %v27_v2 = vand.u32 2147483647, %v25_v0  ;;  %v28_v3 = vand.u32 2147483647, %v26_v1  ;;  %s80_s14 = sshll.u32 %s182_s13, 4  ;;  %s81_s14 = int_to_ptr.vmem [resolvable:$true] %s80_s14 }
   0x9   :  { %v29_v4 = vmax.f32 %v27_v2, %v28_v3 }
   0xb   :  { %30 = vmax.xlane.f32.xlu0 %v29_v4 }
  0x7e   :  { %v31_v5 = vpop.xlane.xlu0 %30 }
  0x7f   :  { %v32_v6 = vrot.slane %v31_v5, 4 }
  0x81   :  { %v33_v7 = vmax.f32 %v31_v5, %v32_v6 }
  0x83   :  { %v34_v8 = vrot.slane %v33_v7, 2 }
  0x85   :  { %v35_v9 = vmax.f32 %v33_v7, %v34_v8 }
  0x87   :  { %v36_v10 = vrot.slane %v35_v9, 1 }
  0x89   :  { %v37_v11 = vmax.f32 %v35_v9, %v36_v10 }
  0x8b   :  { %97 = vpush %v37_v11 }
  0xbc   :  { %s98_s0 = spop %97 }
  0xbd   :  { %v39_v12 = vstv %s98_s0 }
  0xbe   :  { %119 = vtanh.f32 %v39_v12 }
  0xc4   :  { %v120_v13 = vpop.eup %119 }
  0xc5   :  { %121 = vrcp.f32 %v120_v13  ;;  %v54_v17 = vand.u32 2147483648, %v120_v13  ;;  %v52_v19 = vand.u32 2147483647, %v120_v13  ;;  %vm48_vm1 = vweird.f32 %v120_v13 }
  0xc6   :  { %123 = vtanh.f32 %v25_v0 }
  0xc7   :  { %125 = vtanh.f32 %v26_v1  ;;  %v55_v21 = vor.u32 1.1754944e-38, %v54_v17  ;;  %vm53_vm3 = vcmp.eq.f32.partialorder %v52_v19, 8.507059e+37 }
  0xcb   :  { %v122_v14 = vpop.eup %121 }
  0xcc   :  { %v44_v15 = vmul.f32 %v122_v14, %v120_v13  ;;  %vm49_vm0 = vweird.f32 %v122_v14  ;;  %v124_v22 = vpop.eup %123 }
  0xcd   :  { %vm50_vm2 = vmor %vm48_vm1, %vm49_vm0  ;;  %v126_v24 = vpop.eup %125 }
  0xce   :  { %v45_v16 = vsub.f32 1.0, %v44_v15 }
  0xd0   :  { %v46_v18 = vmul.f32 %v122_v14, %v45_v16 }
  0xd2   :  { %v47_v20 = vadd.f32 %v122_v14, %v46_v18 }
  0xd4   :  { %v51_v23 = vsel %vm50_vm2, %v122_v14, %v47_v20 }
  0xd5   :  { %v56_v25 = vsel %vm53_vm3, %v55_v21, %v51_v23 }
  0xd6   :  { %v57_v26 = vmul.f32 0.5, %v56_v25 }
  0xd8   :  { %v58_v27 = vmul.f32 %v124_v22, %v57_v26  ;;  %v59_v28 = vmul.f32 %v126_v24, %v57_v26 }
  0xda   :  { %v60_v29 = vadd.f32 0.5, %v58_v27  ;;  %v61_v30 = vadd.f32 0.5, %v59_v28 }
  0xdc   :  { %v62_v31 = vmul.f32 15.0, %v60_v29  ;;  %v63_v32 = vmul.f32 15.0, %v61_v30 }
  0xde   :  { %v101_v33 = vcvt.f32.s32 %v62_v31  ;;  %v109_v34 = vcvt.f32.s32 %v63_v32  ;;  %v99_v36 = vand.u32 2147483647, %v62_v31  ;;  %v104_v39 = vand.u32 2147483648, %v62_v31 }
  0xdf   :  { %v107_v40 = vand.u32 2147483647, %v63_v32  ;;  %v112_v42 = vand.u32 2147483648, %v63_v32 }
  0xe0   :  { %v102_v35 = vcvt.s32.f32 %v101_v33  ;;  %v110_v37 = vcvt.s32.f32 %v109_v34  ;;  %vm100_vm4 = vcmp.lt.f32.partialorder %v99_v36, 8388608.0 }
  0xe1   :  { %vm108_vm5 = vcmp.lt.f32.partialorder %v107_v40, 8388608.0 }
  0xe2   :  { %v103_v38 = vand.u32 2147483647, %v102_v35  ;;  %v111_v41 = vand.u32 2147483647, %v110_v37 }
  0xe4   :  { %v105_v43 = vor.u32 %v104_v39, %v103_v38  ;;  %v113_v44 = vor.u32 %v112_v42, %v111_v41 }
  0xe6   :  { %v106_v45 = vsel %vm100_vm4, %v105_v43, %v62_v31  ;;  %v114_v46 = vsel %vm108_vm5, %v113_v44, %v63_v32 }
  0xe7   :  { %v66_v47 = vmul.f32 0.06666667, %v106_v45  ;;  %v67_v48 = vmul.f32 0.06666667, %v114_v46 }
  0xe9   :  { %v68_v49 = vmul.f32 2.0, %v66_v47  ;;  %v69_v50 = vmul.f32 2.0, %v67_v48 }
  0xeb   :  { %v95_v51 = vadd.f32 -1.0, %v68_v49  ;;  %v96_v52 = vadd.f32 -1.0, %v69_v50 }
  0xed   :  { %v72_v53 = vmul.f32 %v120_v13, %v95_v51  ;;  %v73_v54 = vmul.f32 %v120_v13, %v96_v52 }
  0xef   :  { %74 = vst [vmem:[#allocation5] sm:$0xff] %v72_v53 }
  0xf0   :  { %75 = vst [vmem:[#allocation5 + $0x8] sm:$0xff] %v73_v54 }
  0xf1   :  { %88 = dma.vmem_to_hbm [thread:$0]  %s81_s14, 256, %s83_s17, [#allocation4], %s180_s11, %s180_s11, %s181_s12  }
  0xf2   :  { %177 = dma.done.wait [#allocation4], 256  }
  0xf3   :  { %178 = vsyncadd [#allocation4], 4294967040 }
  0xf4   :  { %93 = vsyncpa [#allocation3], 1 }
  0xf5   :  { %94 = vsyncpa [#allocation4], 1 }

</bundles_post_ra>
